<compile_context>
chip_gen: v6e
topology: v6e:2x2x1
jax: 0.10.0
libtpu: 0.0.40
codegen_flags: <defaults>
</compile_context>

<pallas_src>
import functools

import jax
import jax.numpy as jnp
from jax.experimental import pallas as pl
from jax.experimental.pallas import tpu as pltpu


def _round_up(x, m):
    return (x + m - 1) // m * m


def _resident_spec(shape):
    """Constant-index (VMEM-resident) block: single-buffered, since the same
    block is reused on every grid step (halves weight/bias VMEM residency)."""
    idx = lambda i: (0,) * len(shape)
    try:
        return pl.BlockSpec(shape, idx, pipeline_mode=pl.Buffered(1))
    except TypeError:
        # Older jax without pipeline_mode kwarg: fall back to default buffering.
        return pl.BlockSpec(shape, idx)


def _fused_mlp_kernel(*refs, num_layers):
    """Fused MLP over one batch tile.

    refs = (x_ref, w0_ref, b0_ref, w1_ref, b1_ref, ..., o_ref)
      x_ref : [TB, D0p]   w_l : [D_{l}p, D_{l+1}p] (bf16)   b_l : [1, D_{l+1}p] (f32)
      o_ref : [TB, DLp]
    The layer loop is unrolled at trace time; intermediate activations stay in
    VMEM/vregs (no HBM round-trips between layers).
    """
    x_ref = refs[0]
    o_ref = refs[-1]

    h = x_ref[...]
    for layer in range(num_layers):
        w_ref = refs[1 + 2 * layer]
        b_ref = refs[2 + 2 * layer]
        # bf16 x bf16 operands -> native MXU rate, f32 accumulation.
        y = jnp.dot(h.astype(jnp.bfloat16), w_ref[...],
                    preferred_element_type=jnp.float32)
        y = y + b_ref[...]          # bias broadcast over batch rows, in f32
        if layer < num_layers - 1:
            # F.leaky_relu, default negative_slope=0.01, single VALU max.
            y = jnp.maximum(y, 0.01 * y)
        h = y
    o_ref[...] = h.astype(o_ref.dtype)


def init_mlp_params(key, input_dim, hidden_dim, output_dim, num_layers):
    """Deterministic init mirroring nn.Linear shapes/default init.

    Weights are stored as [in_features, out_features] (transposed relative to
    PyTorch's [out, in]), so the kernel computes y = x @ W + b."""
    h = [hidden_dim] * (num_layers - 1)
    dims = list(zip([input_dim] + h, h + [output_dim]))
    params = []
    for (n, k) in dims:
        key, wk, bk = jax.random.split(key, 3)
        bound = 1.0 / jnp.sqrt(n)
        w = jax.random.uniform(wk, (n, k), jnp.float32, -bound, bound)
        b = jax.random.uniform(bk, (k,), jnp.float32, -bound, bound)
        params.append((w, b))
    return params


def pad_params_for_tpu(params):
    """Zero-pad feature dims up to multiples of 128 (lane-dense) and cast the
    weights to bf16. Done ONCE, hoisted out of the forward pass. Biases stay
    f32 (bias-add + activation run in f32 inside the kernel)."""
    padded = []
    for w, b in params:
        din, dout = w.shape
        dinp, doutp = _round_up(din, 128), _round_up(dout, 128)
        wp = jnp.zeros((dinp, doutp), jnp.bfloat16).at[:din, :dout].set(
            w.astype(jnp.bfloat16))
        bp = jnp.zeros((1, doutp), jnp.float32).at[0, :dout].set(b)
        padded.append((wp, bp))
    out_dim = params[-1][0].shape[1]
    return padded, out_dim


def _vmem_budget_bytes(padded_params, tb, dp_in, dp_out, act_itemsize):
    """Explicit VMEM budget: single-buffered params + double-buffered
    activation in/out tiles + live intermediate slabs + headroom."""
    param_bytes = sum(w.size * w.dtype.itemsize + b.size * b.dtype.itemsize
                      for w, b in padded_params)
    io_bytes = 2 * (tb * dp_in + tb * dp_out) * act_itemsize  # double-buffered
    max_dout = max(w.shape[1] for w, _ in padded_params)
    # ~2 live f32 intermediate activation slabs at layer boundaries + bf16 copy.
    inter_bytes = tb * max_dout * (2 * 4 + 2)
    budget = param_bytes + io_bytes + inter_bytes
    limit = int(budget * 1.5) + (2 << 20)      # headroom + internal scratch
    limit = max(limit, 8 << 20)                # floor
    limit = min(limit, 64 << 20)               # stay within v7x physical VMEM
    return limit


def mlp_forward(x, padded_params, out_dim, *, batch_tile=256):
    """Single fused pallas_call for the whole MLP stack."""
    num_layers = len(padded_params)
    B, Din = x.shape
    dp_in = padded_params[0][0].shape[0]
    dp_out = padded_params[-1][0].shape[1]
    assert Din <= dp_in

    # Batch tiling: up to `batch_tile` rows per grid step (multiple of 8).
    # Ensure >= 2 grid steps when B > 8 so ("parallel",) can use both
    # TensorCores on v7x.
    tb = min(_round_up(B, 8), batch_tile)
    if B > 8 and _round_up(B, tb) // tb < 2:
        tb = max(_round_up((B + 1) // 2, 8), 8)
    b_pad = _round_up(B, tb)

    # Lane-dense, sublane-aligned activation slab; skip the copy when the
    # input is already the right shape.
    if b_pad == B and Din == dp_in:
        xp = x
    else:
        xp = jnp.zeros((b_pad, dp_in), x.dtype).at[:B, :Din].set(x)

    in_specs = [pl.BlockSpec((tb, dp_in), lambda i: (i, 0))]
    flat_params = []
    for w, b in padded_params:
        din_l, dout_l = w.shape
        # Weights/biases: full resident, single-buffered, constant block index
        # (Pallas skips the re-fetch when the block index doesn't change).
        in_specs.append(_resident_spec((din_l, dout_l)))
        in_specs.append(_resident_spec((1, dout_l)))
        flat_params += [w, b]

    vmem_limit = _vmem_budget_bytes(padded_params, tb, dp_in, dp_out,
                                    x.dtype.itemsize)

    kernel = functools.partial(_fused_mlp_kernel, num_layers=num_layers)
    out_padded = pl.pallas_call(
        kernel,
        out_shape=jax.ShapeDtypeStruct((b_pad, dp_out), x.dtype),
        grid_spec=pltpu.PrefetchScalarGridSpec(
            num_scalar_prefetch=0,
            grid=(b_pad // tb,),
            in_specs=in_specs,
            out_specs=pl.BlockSpec((tb, dp_out), lambda i: (i, 0)),
        ),
        compiler_params=pltpu.CompilerParams(
            dimension_semantics=("parallel",),
            vmem_limit_bytes=vmem_limit),
    )(xp, *flat_params)

    if b_pad == B and out_dim == dp_out:
        return out_padded
    return out_padded[:B, :out_dim]


def _reference_forward_f32(x, params):
    num_layers = len(params)
    for i, (w, b) in enumerate(params):
        x = x @ w + b
        if i < num_layers - 1:
            x = jnp.maximum(x, 0.01 * x)
    return x


def _reference_forward_bf16(x, params):
    """Reference with the same bf16-operand / f32-accumulate matmul precision."""
    num_layers = len(params)
    h = x
    for i, (w, b) in enumerate(params):
        h = jnp.dot(h.astype(jnp.bfloat16), w.astype(jnp.bfloat16),
                    preferred_element_type=jnp.float32) + b
        if i < num_layers - 1:
            h = jnp.maximum(h, 0.01 * h)
    return h


if __name__ == "__main__":
    key = jax.random.PRNGKey(0)
    key, xk, pk = jax.random.split(key, 3)

    batch = 8
    input_dim = 32
    hidden_dim = 64
    output_dim = 16
    num_layers = 3

    x = jax.random.normal(xk, (batch, input_dim), jnp.float32)
    params = init_mlp_params(pk, input_dim, hidden_dim, output_dim, num_layers)

    # One-time padding / bf16 cast of params (hoisted out of the forward pass).
    padded_params, out_dim = pad_params_for_tpu(params)

    fwd = jax.jit(functools.partial(mlp_forward, out_dim=out_dim))
    out = fwd(x, padded_params)
    out = jax.block_until_ready(out)

    assert out.shape == (batch, output_dim)
    # Semantic check vs the full-f32 reference (loose: bf16 matmul operands).
    ref_f32 = _reference_forward_f32(x, params)
    assert jnp.allclose(out, ref_f32, atol=3e-2, rtol=3e-2), (
        jnp.max(jnp.abs(out - ref_f32)))
    # Precision-matched check vs a bf16-operand reference (tight).
    ref_bf16 = _reference_forward_bf16(x, params)
    assert jnp.allclose(out, ref_bf16, atol=2e-3, rtol=2e-3), (
        jnp.max(jnp.abs(out - ref_bf16)))

    print("KERNEL_OK")
</pallas_src>

<mosaic_0001>
module attributes {stable_mosaic.version = 11 : i64} {
  func.func @_fused_mlp_kernel(%arg0: i32, %arg1: memref<8x128xf32, #tpu.memory_space<vmem>>, %arg2: memref<128x128xbf16, #tpu.memory_space<vmem>>, %arg3: memref<1x128xf32, #tpu.memory_space<vmem>>, %arg4: memref<128x128xbf16, #tpu.memory_space<vmem>>, %arg5: memref<1x128xf32, #tpu.memory_space<vmem>>, %arg6: memref<128x128xbf16, #tpu.memory_space<vmem>>, %arg7: memref<1x128xf32, #tpu.memory_space<vmem>>, %arg8: memref<8x128xf32, #tpu.memory_space<vmem>>) attributes {dimension_semantics = [#tpu.dimension_semantics<parallel>], iteration_bounds = array<i64: 1>, scalar_prefetch = 0 : i64, scratch_operands = 0 : i64, tpu.core_type = #tpu.core_type<tc>, window_params = [{transform_indices = @transform_0, window_bounds = array<i64: 8, 128>}, {pipeline_mode = #tpu.pipeline_mode<synchronous>, transform_indices = @transform_1, window_bounds = array<i64: 128, 128>}, {pipeline_mode = #tpu.pipeline_mode<synchronous>, transform_indices = @transform_2, window_bounds = array<i64: 1, 128>}, {pipeline_mode = #tpu.pipeline_mode<synchronous>, transform_indices = @transform_3, window_bounds = array<i64: 128, 128>}, {pipeline_mode = #tpu.pipeline_mode<synchronous>, transform_indices = @transform_4, window_bounds = array<i64: 1, 128>}, {pipeline_mode = #tpu.pipeline_mode<synchronous>, transform_indices = @transform_5, window_bounds = array<i64: 128, 128>}, {pipeline_mode = #tpu.pipeline_mode<synchronous>, transform_indices = @transform_6, window_bounds = array<i64: 1, 128>}, {transform_indices = @transform_7, window_bounds = array<i64: 8, 128>}]} {
    %c0 = arith.constant 0 : index
    %c0_0 = arith.constant 0 : index
    %0 = vector.load %arg1[%c0, %c0_0] : memref<8x128xf32, #tpu.memory_space<vmem>>, vector<8x128xf32>
    %1 = arith.truncf %0 : vector<8x128xf32> to vector<8x128xbf16>
    %c0_1 = arith.constant 0 : index
    %c0_2 = arith.constant 0 : index
    %2 = vector.load %arg2[%c0_1, %c0_2] : memref<128x128xbf16, #tpu.memory_space<vmem>>, vector<128x128xbf16>
    %cst = arith.constant dense<0.000000e+00> : vector<8x128xf32>
    %3 = tpu.matmul %1, %2, %cst {dimension_numbers = #tpu.dot_dimension_numbers<[1], [0], [0], [1], [0, 0, 1, 1], [], []>} : vector<8x128xbf16>, vector<128x128xbf16>, vector<8x128xf32> -> vector<8x128xf32>
    %c0_3 = arith.constant 0 : index
    %c0_4 = arith.constant 0 : index
    %4 = vector.load %arg3[%c0_3, %c0_4] : memref<1x128xf32, #tpu.memory_space<vmem>>, vector<1x128xf32>
    %5 = vector.broadcast %4 : vector<1x128xf32> to vector<8x128xf32>
    %6 = arith.addf %3, %5 : vector<8x128xf32>
    %cst_5 = arith.constant 0.00999999977 : f32
    %7 = vector.broadcast %cst_5 : f32 to vector<8x128xf32>
    %8 = arith.mulf %7, %6 : vector<8x128xf32>
    %9 = arith.maximumf %6, %8 : vector<8x128xf32>
    %10 = arith.truncf %9 : vector<8x128xf32> to vector<8x128xbf16>
    %c0_6 = arith.constant 0 : index
    %c0_7 = arith.constant 0 : index
    %11 = vector.load %arg4[%c0_6, %c0_7] : memref<128x128xbf16, #tpu.memory_space<vmem>>, vector<128x128xbf16>
    %cst_8 = arith.constant dense<0.000000e+00> : vector<8x128xf32>
    %12 = tpu.matmul %10, %11, %cst_8 {dimension_numbers = #tpu.dot_dimension_numbers<[1], [0], [0], [1], [0, 0, 1, 1], [], []>} : vector<8x128xbf16>, vector<128x128xbf16>, vector<8x128xf32> -> vector<8x128xf32>
    %c0_9 = arith.constant 0 : index
    %c0_10 = arith.constant 0 : index
    %13 = vector.load %arg5[%c0_9, %c0_10] : memref<1x128xf32, #tpu.memory_space<vmem>>, vector<1x128xf32>
    %14 = vector.broadcast %13 : vector<1x128xf32> to vector<8x128xf32>
    %15 = arith.addf %12, %14 : vector<8x128xf32>
    %cst_11 = arith.constant 0.00999999977 : f32
    %16 = vector.broadcast %cst_11 : f32 to vector<8x128xf32>
    %17 = arith.mulf %16, %15 : vector<8x128xf32>
    %18 = arith.maximumf %15, %17 : vector<8x128xf32>
    %19 = arith.truncf %18 : vector<8x128xf32> to vector<8x128xbf16>
    %c0_12 = arith.constant 0 : index
    %c0_13 = arith.constant 0 : index
    %20 = vector.load %arg6[%c0_12, %c0_13] : memref<128x128xbf16, #tpu.memory_space<vmem>>, vector<128x128xbf16>
    %cst_14 = arith.constant dense<0.000000e+00> : vector<8x128xf32>
    %21 = tpu.matmul %19, %20, %cst_14 {dimension_numbers = #tpu.dot_dimension_numbers<[1], [0], [0], [1], [0, 0, 1, 1], [], []>} : vector<8x128xbf16>, vector<128x128xbf16>, vector<8x128xf32> -> vector<8x128xf32>
    %c0_15 = arith.constant 0 : index
    %c0_16 = arith.constant 0 : index
    %22 = vector.load %arg7[%c0_15, %c0_16] : memref<1x128xf32, #tpu.memory_space<vmem>>, vector<1x128xf32>
    %23 = vector.broadcast %22 : vector<1x128xf32> to vector<8x128xf32>
    %24 = arith.addf %21, %23 : vector<8x128xf32>
    %c0_17 = arith.constant 0 : index
    %c0_18 = arith.constant 0 : index
    %25 = vector.load %arg8[%c0_17, %c0_18] : memref<8x128xf32, #tpu.memory_space<vmem>>, vector<8x128xf32>
    tpu.vector_store %arg8[%c0_17, %c0_18], %24 {strides = array<i32>} : memref<8x128xf32, #tpu.memory_space<vmem>>, vector<8x128xf32>,
    return
  }
  func.func @transform_0(%arg0: i32) -> (i32, i32) {
    %c0_i32 = arith.constant 0 : i32
    %c0_i32_0 = arith.constant 0 : i32
    return %arg0, %c0_i32 : i32, i32
  }
  func.func @transform_1(%arg0: i32) -> (i32, i32) {
    %c0_i32 = arith.constant 0 : i32
    %c0_i32_0 = arith.constant 0 : i32
    %c0_i32_1 = arith.constant 0 : i32
    return %c0_i32, %c0_i32_0 : i32, i32
  }
  func.func @transform_2(%arg0: i32) -> (i32, i32) {
    %c0_i32 = arith.constant 0 : i32
    %c0_i32_0 = arith.constant 0 : i32
    %c0_i32_1 = arith.constant 0 : i32
    return %c0_i32, %c0_i32_0 : i32, i32
  }
  func.func @transform_3(%arg0: i32) -> (i32, i32) {
    %c0_i32 = arith.constant 0 : i32
    %c0_i32_0 = arith.constant 0 : i32
    %c0_i32_1 = arith.constant 0 : i32
    return %c0_i32, %c0_i32_0 : i32, i32
  }
  func.func @transform_4(%arg0: i32) -> (i32, i32) {
    %c0_i32 = arith.constant 0 : i32
    %c0_i32_0 = arith.constant 0 : i32
    %c0_i32_1 = arith.constant 0 : i32
    return %c0_i32, %c0_i32_0 : i32, i32
  }
  func.func @transform_5(%arg0: i32) -> (i32, i32) {
    %c0_i32 = arith.constant 0 : i32
    %c0_i32_0 = arith.constant 0 : i32
    %c0_i32_1 = arith.constant 0 : i32
    return %c0_i32, %c0_i32_0 : i32, i32
  }
  func.func @transform_6(%arg0: i32) -> (i32, i32) {
    %c0_i32 = arith.constant 0 : i32
    %c0_i32_0 = arith.constant 0 : i32
    %c0_i32_1 = arith.constant 0 : i32
    return %c0_i32, %c0_i32_0 : i32, i32
  }
  func.func @transform_7(%arg0: i32) -> (i32, i32) {
    %c0_i32 = arith.constant 0 : i32
    %c0_i32_0 = arith.constant 0 : i32
    return %arg0, %c0_i32 : i32, i32
  }
}

</mosaic_0001>

<bundles_post_ra>
// kernel: mlp_forward.1
= control target key start
LH: loop header
LB: loop body
LE: loop exit
PB: predicated region body
PF: predicated region fallthrough
CT: control target
= control target key end

     0   :  { %12 = vsyncpa [#allocation3], 0  ;;  %s761_s0 = inlined_call_operand.vmem [shape: f32[8,128], index: 0, kind: input, shape index: {}]   ;;  %s762_s1 = inlined_call_operand.hbm [shape: bf16[128,128], index: 1, kind: input, shape index: {}]   ;;  %s763_s2 = inlined_call_operand.vmem [shape: f32[1,128], index: 2, kind: input, shape index: {}]   ;;  %s764_s3 = inlined_call_operand.hbm [shape: bf16[128,128], index: 3, kind: input, shape index: {}]   ;;  %s765_s4 = inlined_call_operand.vmem [shape: f32[1,128], index: 4, kind: input, shape index: {}]   ;;  %s766_s5 = inlined_call_operand.hbm [shape: bf16[128,128], index: 5, kind: input, shape index: {}]   ;;  %s767_s6 = inlined_call_operand.vmem [shape: f32[1,128], index: 6, kind: input, shape index: {}]   ;;  %s768_s7 = inlined_call_operand.hbm [shape: f32[8,128], index: 7, kind: output, shape index: {}]  }
   0x1   :  { %13 = vsyncpa [#allocation6], 0 }
   0x2   :  { %14 = vsyncpa [#allocation4], 0  ;;  %s659_s24 = smov [#allocation5]   ;;  %s660_s26 = smov [#allocation2]  }
   0x3   :  { %s36_s25 = sshll.u32 %s659_s24, 4  ;;  %s22_s27 = sshll.u32 %s660_s26, 4  ;;  %s37_s25 = int_to_ptr.vmem [resolvable:$true] %s36_s25  ;;  %s23_s27 = int_to_ptr.vmem [resolvable:$true] %s22_s27 }
   0x4   :  { %s581_s28 = scalar_lea.vmem %s37_s25, 1024  ;;  %p586_p1 = scmp.lt.s32.totalorder %s37_s25, %s37_s25 }
   0x5   :  { %p582_p0 = scmp.ne.s32.totalorder %s37_s25, %s581_s28  ;;  %p587_p2 = scmp.lt.s32.totalorder %s581_s28, %s581_s28 }
   0x7   :  { %p588_p3 = por %p587_p2, %p586_p1 }
   0x9   :  { %p589_p4 = pnand %p588_p3, %p582_p0 }
   0xb   :  { %592 = shalt.err (!%p589_p4)
}
   0xc   :  { %s661_s29 = smov 64   ;;  %s662_s30 = smov 4  }
   0xd   :  { %42 = dma.hbm_to_vmem [thread:$0]  %s764_s3, 1024, %s37_s25, [#allocation6], %s661_s29, %s661_s29, %s662_s30  }
   0xe   :  { %s601_s10 = scalar_lea.vmem %s23_s27, 1024  ;;  %p606_p6 = scmp.lt.s32.totalorder %s23_s27, %s23_s27 }
   0xf   :  { %p602_p5 = scmp.ne.s32.totalorder %s23_s27, %s601_s10  ;;  %p607_p7 = scmp.lt.s32.totalorder %s601_s10, %s601_s10 }
  0x11   :  { %p608_p8 = por %p607_p7, %p606_p6 }
  0x13   :  { %p609_p9 = pnand %p608_p8, %p602_p5 }
  0x15   :  { %612 = shalt.err (!%p609_p9)
}
  0x16   :  { %28 = dma.hbm_to_vmem [thread:$0]  %s762_s1, 1024, %s23_s27, [#allocation3], %s661_s29, %s661_s29, %s662_s30  }
  0x17   :  { %s663_s13 = smov [#allocation7]  }
  0x18   :  { %s50_s14 = sshll.u32 %s663_s13, 4  ;;  %s51_s14 = int_to_ptr.vmem [resolvable:$true] %s50_s14 }
  0x19   :  { %s621_s15 = scalar_lea.vmem %s51_s14, 1024  ;;  %p626_p11 = scmp.lt.s32.totalorder %s51_s14, %s51_s14 }
  0x1a   :  { %p622_p10 = scmp.ne.s32.totalorder %s51_s14, %s621_s15  ;;  %p627_p12 = scmp.lt.s32.totalorder %s621_s15, %s621_s15 }
  0x1c   :  { %p628_p13 = por %p627_p12, %p626_p11 }
  0x1e   :  { %p629_p0 = pnand %p628_p13, %p622_p10 }
  0x20   :  { %632 = shalt.err (!%p629_p0)
}
  0x21   :  { %56 = dma.hbm_to_vmem [thread:$0]  %s766_s5, 1024, %s51_s14, [#allocation6], %s661_s29, %s661_s29, %s662_s30  }
  0x22   :  { %653 = dma.done.wait [#allocation3], 1024  }
  0x23   :  { %654 = vsyncadd [#allocation3], 4294966272 }
  0x24   :  { %655 = dma.done.wait [#allocation6], 2048  }
  0x25   :  { %656 = vsyncadd [#allocation6], 4294965248  ;;  %v664_v0 = vmov 0.0   ;;  %vm665_vm0 = vmmov 0   ;;  %v549_v1 = vld [vmem:[#allocation2 + $0x38] sm:$0xff]   ;;  %v550_v2 = vld [vmem:[#allocation2 + $0x30] sm:$0xff]  }
  0x26   :  { %481 = vmatprep.subr.bf16.mxu0 %v664_v0  ;;  %497 = vmatprep.mubr.msk.bf16.mxu0 %vm665_vm0, %v664_v0  ;;  %v551_v3 = vld [vmem:[#allocation2 + $0x28] sm:$0xff]   ;;  %v557_v4 = vld [vmem:[#allocation5 + $0x38] sm:$0xff]   ;;  %v552_v5 = vld [vmem:[#allocation2 + $0x20] sm:$0xff]   ;;  %s666_s21 = smov [#allocation8]  }
  0x27   :  { %501 = vmatprep.subr.bf16.mxu1 %v664_v0  ;;  %517 = vmatprep.mubr.msk.bf16.mxu1 %vm665_vm0, %v664_v0  ;;  %v558_v6 = vld [vmem:[#allocation5 + $0x30] sm:$0xff]   ;;  %v553_v7 = vld [vmem:[#allocation2 + $0x18] sm:$0xff]   ;;  %v559_v8 = vld [vmem:[#allocation5 + $0x28] sm:$0xff]   ;;  %s417_s22 = sshll.u32 %s666_s21, 4  ;;  %s418_s22 = int_to_ptr.vmem [resolvable:$true] %s417_s22 }
  0x28   :  { %482 = vmatpush3.bf16.msra.mxu0 %v549_v1  ;;  %502 = vmatpush3.bf16.msra.mxu1 %v557_v4  ;;  %v554_v9 = vld [vmem:[#allocation2 + $0x10] sm:$0xff]   ;;  %v560_v10 = vld [vmem:[#allocation5 + $0x20] sm:$0xff]   ;;  %v555_v11 = vld [vmem:[#allocation2 + $0x8] sm:$0xff]   ;;  %p638_p2 = scmp.lt.s32.totalorder %s418_s22, %s418_s22 }
  0x29   :  { %483 = vmatprep.subr.bf16.mxu0 %v664_v0  ;;  %503 = vmatprep.subr.bf16.mxu1 %v664_v0  ;;  %v561_v12 = vld [vmem:[#allocation5 + $0x18] sm:$0xff]   ;;  %v556_v13 = vld [vmem:[#allocation2] sm:$0xff]   ;;  %v562_v15 = vld [vmem:[#allocation5 + $0x10] sm:$0xff]  }
  0x2a   :  { %v69_v14 = vld [vmem:[%s761_s0] sm:$0xff]  ;;  %v563_v17 = vld [vmem:[#allocation5 + $0x8] sm:$0xff]   ;;  %v565_v19 = vld [vmem:[#allocation7 + $0x38] sm:$0xff]  }
  0x2b   :  { %v70_v16 = vpack.c.bf16 %v69_v14, %v69_v14  ;;  %v564_v18 = vld [vmem:[#allocation5] sm:$0xff]   ;;  %v566_v20 = vld [vmem:[#allocation7 + $0x30] sm:$0xff]   ;;  %v567_v21 = vld [vmem:[#allocation7 + $0x28] sm:$0xff]  }
  0x2c   :  { %484 = vmatpush3.bf16.msra.mxu0 %v550_v2  ;;  %504 = vmatpush3.bf16.msra.mxu1 %v558_v6  ;;  %v568_v22 = vld [vmem:[#allocation7 + $0x20] sm:$0xff]   ;;  %v569_v23 = vld [vmem:[#allocation7 + $0x18] sm:$0xff]   ;;  %v570_v24 = vld [vmem:[#allocation7 + $0x10] sm:$0xff]  }
  0x2d   :  { %485 = vmatprep.subr.bf16.mxu0 %v664_v0  ;;  %505 = vmatprep.subr.bf16.mxu1 %v664_v0  ;;  %v427_v25 = vld [vmem:[%s763_s2] ss:$0 sm:$0xff]  ;;  %v571_v34 = vld [vmem:[#allocation7 + $0x8] sm:$0xff]  }
  0x2e   :  { %v572_v35 = vld [vmem:[#allocation7] sm:$0xff]  }
  0x2f   :  { %v436_v36 = vld [vmem:[%s765_s4] ss:$0 sm:$0xff]  ;;  %s633_s4 = scalar_lea.vmem %s418_s22, 128 }
  0x30   :  { %486 = vmatpush3.bf16.msra.mxu0 %v551_v3  ;;  %506 = vmatpush3.bf16.msra.mxu1 %v559_v8  ;;  %v445_v45 = vld [vmem:[%s767_s6] ss:$0 sm:$0xff]  ;;  %p634_p1 = scmp.ne.s32.totalorder %s418_s22, %s633_s4  ;;  %p639_p3 = scmp.lt.s32.totalorder %s633_s4, %s633_s4 }
  0x31   :  { %487 = vmatprep.subr.bf16.mxu0 %v664_v0  ;;  %507 = vmatprep.subr.bf16.mxu1 %v664_v0 }
  0x32   :  { %p640_p4 = por %p639_p3, %p638_p2 }
  0x34   :  { %488 = vmatpush3.bf16.msra.mxu0 %v552_v5  ;;  %508 = vmatpush3.bf16.msra.mxu1 %v560_v10  ;;  %p641_p5 = pnand %p640_p4, %p634_p1 }
  0x35   :  { %489 = vmatprep.subr.bf16.mxu0 %v664_v0  ;;  %509 = vmatprep.subr.bf16.mxu1 %v664_v0 }
  0x38   :  { %490 = vmatpush3.bf16.msra.mxu0 %v553_v7  ;;  %510 = vmatpush3.bf16.msra.mxu1 %v561_v12 }
  0x39   :  { %491 = vmatprep.subr.bf16.mxu0 %v664_v0  ;;  %511 = vmatprep.subr.bf16.mxu1 %v664_v0 }
  0x3c   :  { %492 = vmatpush3.bf16.msra.mxu0 %v554_v9  ;;  %512 = vmatpush3.bf16.msra.mxu1 %v562_v15 }
  0x3d   :  { %493 = vmatprep.subr.bf16.mxu0 %v664_v0  ;;  %513 = vmatprep.subr.bf16.mxu1 %v664_v0 }
  0x40   :  { %494 = vmatpush3.bf16.msra.mxu0 %v555_v11  ;;  %514 = vmatpush3.bf16.msra.mxu1 %v563_v17 }
  0x41   :  { %495 = vmatprep.subr.bf16.mxu0 %v664_v0  ;;  %515 = vmatprep.subr.bf16.mxu1 %v664_v0 }
  0x44   :  { %496 = vmatpush3.bf16.msra.mxu0 %v556_v13  ;;  %516 = vmatpush3.bf16.msra.mxu1 %v564_v18 }
  0x45   :  { %521 = vmatprep.subr.bf16.mxu0 %v664_v0 }
  0x47   :  { %498 = vmatmul.mubr.bf16.vlgmr.msra.gmra.mxu0 %v70_v16 }
  0x48   :  { %537 = vmatprep.mubr.msk.bf16.mxu0 %vm665_vm0, %v664_v0  ;;  %522 = vmatpush3.bf16.msra.mxu0 %v565_v19 }
  0x49   :  { %523 = vmatprep.subr.bf16.mxu0 %v664_v0 }
  0x4c   :  { %524 = vmatpush3.bf16.msra.mxu0 %v566_v20 }
  0x4d   :  { %525 = vmatprep.subr.bf16.mxu0 %v664_v0 }
  0x50   :  { %526 = vmatpush3.bf16.msra.mxu0 %v567_v21 }
  0x51   :  { %527 = vmatprep.subr.bf16.mxu0 %v664_v0 }
  0x54   :  { %528 = vmatpush3.bf16.msra.mxu0 %v568_v22 }
  0x55   :  { %529 = vmatprep.subr.bf16.mxu0 %v664_v0 }
  0x58   :  { %530 = vmatpush3.bf16.msra.mxu0 %v569_v23 }
  0x59   :  { %531 = vmatprep.subr.bf16.mxu0 %v664_v0 }
  0x5c   :  { %532 = vmatpush3.bf16.msra.mxu0 %v570_v24 }
  0x5d   :  { %533 = vmatprep.subr.bf16.mxu0 %v664_v0 }
  0x60   :  { %534 = vmatpush3.bf16.msra.mxu0 %v571_v34 }
  0x61   :  { %535 = vmatprep.subr.bf16.mxu0 %v664_v0 }
  0x64   :  { %536 = vmatpush3.bf16.msra.mxu0 %v572_v35 }
 0x107   :  { %v176_v26 = vpop.f32.mrf.mxu0 }
 0x108   :  { %v177_v27 = vadd.f32 %v427_v25, %v176_v26 }
 0x109   :  { %v499_v28 = vpop.f32.mrf.mxu0 }
 0x10a   :  { %v182_v29 = vmul.f32 0.01, %v177_v27 }
 0x10b   :  { %v179_v30 = vpop.f32.mrf.mxu0 }
 0x10c   :  { %v183_v31 = vmax.f32 %v177_v27, %v182_v29 }
 0x10d   :  { %v500_v32 = vpop.f32.mrf.mxu0 }
 0x10e   :  { %v184_v33 = vpack.c.bf16 %v183_v31, %v183_v31 }
 0x110   :  { %518 = vmatmul.mubr.bf16.vlgmr.msra.gmra.mxu1 %v184_v33 }
 0x1d0   :  { %v290_v37 = vpop.f32.mrf.mxu1 }
 0x1d1   :  { %v291_v38 = vadd.f32 %v436_v36, %v290_v37 }
 0x1d2   :  { %v519_v39 = vpop.f32.mrf.mxu1 }
 0x1d3   :  { %v296_v40 = vmul.f32 0.01, %v291_v38 }
 0x1d4   :  { %v293_v41 = vpop.f32.mrf.mxu1 }
 0x1d5   :  { %v297_v42 = vmax.f32 %v291_v38, %v296_v40 }
 0x1d6   :  { %v520_v43 = vpop.f32.mrf.mxu1 }
 0x1d7   :  { %v298_v44 = vpack.c.bf16 %v297_v42, %v297_v42 }
 0x1d9   :  { %538 = vmatmul.mubr.bf16.vlgmr.msra.gmra.mxu0 %v298_v44 }
 0x299   :  { %v404_v46 = vpop.f32.mrf.mxu0 }
 0x29a   :  { %v405_v47 = vadd.f32 %v445_v45, %v404_v46 }
 0x29b   :  { %v539_v48 = vpop.f32.mrf.mxu0 }
 0x29c   :  { %410 = vst [vmem:[#allocation8] sm:$0xff] %v405_v47 }
 0x29d   :  { %v407_v49 = vpop.f32.mrf.mxu0 }
 0x29e   :  { %644 = shalt.err (!%p641_p5)
}
 0x29f   :  { %420 = dma.vmem_to_hbm [thread:$0]  %s418_s22, 128, %s768_s7, [#allocation4]   ;;  %v540_v50 = vpop.f32.mrf.mxu0 }
 0x2a0   :  { %657 = dma.done.wait [#allocation4], 128  }
 0x2a1   :  { %658 = vsyncadd [#allocation4], 4294967168 }
 0x2a2   :  { %424 = vsyncpa [#allocation3], 1 }
 0x2a3   :  { %425 = vsyncpa [#allocation6], 1 }
 0x2a4   :  { %426 = vsyncpa [#allocation4], 1 }

</bundles_post_ra>
